<compile_context>
chip_gen: v5e
topology: v5e:2x2
jax: 0.10.0
libtpu: 0.0.40
codegen_flags: <defaults>
</compile_context>

<pallas_src>
import functools

import numpy as np
import jax
import jax.numpy as jnp
from jax.experimental import pallas as pl
from jax.experimental.pallas import tpu as pltpu


# ---------------------------------------------------------------------------
# Fused kernel: upsample x2 + dwconv3x3+BN+ReLU + conv3x3+BN+ReLU
# ---------------------------------------------------------------------------
def _fused_upsample_kernel(x_ref, b_ref, b1_ref, m_ref, b2_ref, o_ref, *, th, h, wcout):
    """Lane-packed layout (lane index = width*channels):

      x_ref : (H+4, W*Cin)            f32 original-res input, 2 zero rows top/bottom
      b_ref : (2, 2*W*Cin, 2W*Cin)    bf16 stage-1 K-merged banded mats [B_even, B_odd]
      b1_ref: (1, 2W*Cin)             f32 stage-1 (BN-folded) bias, tiled across width
      m_ref : (3*2W*Cin, 2W*Cout)     bf16 stage-2 K-merged banded mats vstack(M0,M1,M2)
      b2_ref: (1, 2W*Cout)            f32 stage-2 (BN-folded) bias, tiled across width
      o_ref : (TH, 2*2W*Cout)         f32 output; lanes = [even-row block | odd-row block]
    """
    t = pl.program_id(1)
    f32 = jnp.float32
    bf16 = jnp.bfloat16

    # Row slab of the (2-row zero padded) input needed by this tile (incl. halo).
    row0 = pl.multiple_of(t * th, th)
    xl = x_ref[pl.ds(row0, th + 4), :]                       # (TH+4, W*Cin) f32
    # K-merged stage-1 LHS: xcat[j] = [x[k-1] | x[k]] with k = t*th - 1 + j.
    xcat = jnp.concatenate([xl[0:th + 3, :], xl[1:th + 4, :]], axis=-1).astype(bf16)

    # Stage 1: nearest-x2 upsample + depthwise 3x3 + bias + ReLU.  Single-pass bf16
    # MXU dots (f32 accumulation), phase split into even/odd upsampled rows.
    b1 = b1_ref[...]
    ze = jnp.dot(xcat[0:th + 2], b_ref[0], preferred_element_type=f32) + b1
    zo = jnp.dot(xcat[1:th + 3], b_ref[1], preferred_element_type=f32) + b1
    ze = jnp.maximum(ze, 0.0)
    zo = jnp.maximum(zo, 0.0)

    # Rows falling outside the image are the dense conv's zero padding, not data.
    # (Cheap VPU work; not the binding slot, so kept unconditional.)
    k = jax.lax.broadcasted_iota(jnp.int32, (th + 2, 1), 0) + (t * th - 1)
    valid = jnp.logical_and(k >= 0, k < h)
    ze = jnp.where(valid, ze, 0.0).astype(bf16)
    zo = jnp.where(valid, zo, 0.0).astype(bf16)

    # Stage 2: dense 3x3 conv + bias + ReLU.  Row taps K-merged (K = 3*2W*Cin);
    # lane-aligned (multiple-of-128) concats only.
    m = m_ref[...]
    b2 = b2_ref[...]
    ce = jnp.concatenate([zo[0:th], ze[1:th + 1], zo[1:th + 1]], axis=-1)
    co = jnp.concatenate([ze[1:th + 1], zo[1:th + 1], ze[2:th + 2]], axis=-1)
    oe = jnp.dot(ce, m, preferred_element_type=f32) + b2
    oo = jnp.dot(co, m, preferred_element_type=f32) + b2
    # Phase-packed, lane-dense stores: [even rows | odd rows] along lanes.
    o_ref[:, 0:wcout] = jnp.maximum(oe, 0.0).astype(o_ref.dtype)
    o_ref[:, wcout:2 * wcout] = jnp.maximum(oo, 0.0).astype(o_ref.dtype)


def _fused_upsample_x2(xp2, bmats, b1, mmats, b2, *, h, win, cin, cout, th):
    n = xp2.shape[0]
    wup = 2 * win
    grid = (n, h // th)
    kernel = functools.partial(_fused_upsample_kernel, th=th, h=h, wcout=wup * cout)
    return pl.pallas_call(
        kernel,
        out_shape=jax.ShapeDtypeStruct((n, h, 2 * wup * cout), jnp.float32),
        grid_spec=pltpu.PrefetchScalarGridSpec(
            num_scalar_prefetch=0,
            grid=grid,
            in_specs=[
                # whole (tiny, original-res) padded input stays resident across row tiles
                pl.BlockSpec((None, h + 4, win * cin), lambda nn, tt: (nn, 0, 0)),
                pl.BlockSpec((2, wup * cin, wup * cin), lambda nn, tt: (0, 0, 0)),
                pl.BlockSpec((1, wup * cin), lambda nn, tt: (0, 0)),
                pl.BlockSpec((3 * wup * cin, wup * cout), lambda nn, tt: (0, 0)),
                pl.BlockSpec((1, wup * cout), lambda nn, tt: (0, 0)),
            ],
            out_specs=pl.BlockSpec((None, th, 2 * wup * cout), lambda nn, tt: (nn, tt, 0)),
        ),
        compiler_params=pltpu.CompilerParams(
            dimension_semantics=("parallel", "parallel")),
    )(xp2, bmats, b1, mmats, b2)


# ---------------------------------------------------------------------------
# Host-side parameter glue: BN folding + K-merged banded lane-mixing matrices
# ---------------------------------------------------------------------------
def _stage1_mats(dw, win, c):
    """Fold {nearest-x2 column upsample + depthwise 3x3 + column zero pad} into the two
    K-merged (2*W*C, 2W*C) matrices acting on lane-packed row pairs [x[k-1]|x[k]]."""
    wup = 2 * win
    p = np.zeros((win * c, (wup + 2) * c), np.float32)       # column upsample (+pad cols)
    for j in range(win):
        for dj in range(2):
            for ch in range(c):
                p[j * c + ch, (2 * j + dj + 1) * c + ch] = 1.0
    d = np.zeros((3, (wup + 2) * c, wup * c), np.float32)    # per-row-tap column mixing
    for dy in range(3):
        for dx in range(3):
            for j in range(wup):
                for ch in range(c):
                    d[dy, (j + dx) * c + ch, j * c + ch] += dw[dy, dx, ch]
    b00, b01 = p @ d[0], p @ (d[1] + d[2])
    b10, b11 = p @ (d[0] + d[1]), p @ d[2]
    # z_even = [x[k-1]|x[k]] @ vstack(B00,B01);  z_odd = [x[k]|x[k+1]] @ vstack(B10,B11)
    return np.stack([np.concatenate([b00, b01], axis=0),
                     np.concatenate([b10, b11], axis=0)])


def _stage2_mats(wd, wup, cin, cout):
    """Fold the dense 3x3 conv's (dx, ci->co) mixing + column zero pad into one K-merged
    (3*2W*Cin, 2W*Cout) matrix acting on [z[u-1]|z[u]|z[u+1]] lane-packed rows."""
    m = np.zeros((3, wup * cin, wup * cout), np.float32)
    for dy in range(3):
        for dx in range(3):
            for j in range(wup):
                sj = j + dx - 1
                if 0 <= sj < wup:
                    m[dy, sj * cin:(sj + 1) * cin, j * cout:(j + 1) * cout] = wd[dy, dx]
    return np.concatenate([m[0], m[1], m[2]], axis=0)


def make_upsample_params(key, in_channels, out_channels, width):
    """Deterministic synthetic conv+BN params (BN eval-mode folded) plus the
    lane-packed, K-merged banded operands consumed by the fused Pallas kernel."""
    kd, ko = jax.random.split(key, 2)

    def conv_bn(k, shape):
        ks = jax.random.split(k, 6)
        nout = shape[-1]
        w = 0.1 * jax.random.normal(ks[0], shape, jnp.float32)
        b = 0.1 * jax.random.normal(ks[1], (nout,), jnp.float32)
        gamma = 1.0 + 0.1 * jax.random.normal(ks[2], (nout,), jnp.float32)
        beta = 0.1 * jax.random.normal(ks[3], (nout,), jnp.float32)
        mean = 0.1 * jax.random.normal(ks[4], (nout,), jnp.float32)
        var = 1.0 + 0.5 * jax.random.uniform(ks[5], (nout,), jnp.float32)
        s = gamma / jnp.sqrt(var + 1e-5)
        return w * s, (b - mean) * s + beta

    dw_w, dw_b = conv_bn(kd, (3, 3, in_channels))                   # depthwise (HWC)
    out_w, out_b = conv_bn(ko, (3, 3, in_channels, out_channels))   # dense (HWIO)
    # bf16-round the folded conv weights once, so the bf16 MXU kernel and the f32
    # reference consume bit-identical weight values.
    dw_w = dw_w.astype(jnp.bfloat16).astype(jnp.float32)
    out_w = out_w.astype(jnp.bfloat16).astype(jnp.float32)

    wup = 2 * width
    bmats = _stage1_mats(np.asarray(dw_w), width, in_channels)
    mmats = _stage2_mats(np.asarray(out_w), wup, in_channels, out_channels)
    return {
        # folded 3x3-form params (used by the pure-JAX reference)
        "dw_w": dw_w, "dw_b": dw_b, "out_w": out_w, "out_b": out_b,
        # lane-packed, K-merged operands for the fused Pallas kernel (bf16 MXU path)
        "B": jnp.asarray(bmats).astype(jnp.bfloat16),          # (2, 2W*Cin, 2W*Cin)
        "M": jnp.asarray(mmats).astype(jnp.bfloat16),          # (3*2W*Cin, 2W*Cout)
        "b1": jnp.tile(dw_b, wup).reshape(1, wup * in_channels),
        "b2": jnp.tile(out_b, wup).reshape(1, wup * out_channels),
    }


# ---------------------------------------------------------------------------
# Forward (matches upsample.forward; x is NCHW like PyTorch)
# ---------------------------------------------------------------------------
def _pick_row_tile(h):
    for t in (128, 64, 32, 16, 8):
        if h % t == 0:
            return t
    return h  # TODO(synk): re-tile rows for very large non-multiple-of-8 heights (VMEM)


@functools.partial(jax.jit, static_argnames=("scale", "out_layout"))
def upsample_forward(x_nchw, params, scale=2, out_layout="NCHW"):
    if scale != 2:
        # TODO(synk): scale=4 path (up4 -> dwconv -> dwconv -> conv) is not implemented
        # in the fused kernel; only the default scale=2 path is.
        raise NotImplementedError("fused Pallas upsample implements scale=2 only")
    n, cin, h, w = x_nchw.shape
    cout = params["M"].shape[-1] // (2 * w)
    # NCHW -> lane-packed (N, H, W*C); pad 2 zero rows top/bottom so every row tile
    # (incl. its halo) indexes in range.  Only the SMALL original-resolution input is
    # touched here; the upsampled tensor never hits HBM as an intermediate.
    x = jnp.transpose(x_nchw, (0, 2, 3, 1)).reshape(n, h, w * cin)
    xp2 = jnp.pad(x, ((0, 0), (2, 2), (0, 0)))
    th = _pick_row_tile(h)
    packed = _fused_upsample_x2(xp2, params["B"], params["b1"],
                                params["M"], params["b2"],
                                h=h, win=w, cin=cin, cout=cout, th=th)
    # Kernel emits even/odd upsampled rows phase-packed along lanes, so the row
    # interleave + NHWC unpack is a FREE reshape (no extra HBM pass).
    out_nhwc = packed.reshape(n, 2 * h, 2 * w, cout)
    if out_layout == "NHWC":
        return out_nhwc                               # skips the final transpose pass
    return jnp.transpose(out_nhwc, (0, 3, 1, 2))      # NCHW, matching the PyTorch module


# ---------------------------------------------------------------------------
# Pure-JAX reference (silent correctness check)
# ---------------------------------------------------------------------------
def _ref_forward(x_nchw, params, scale=2):
    x = jnp.transpose(x_nchw, (0, 2, 3, 1))
    x = jnp.repeat(jnp.repeat(x, scale, axis=1), scale, axis=2)
    c = x.shape[-1]
    y = jax.lax.conv_general_dilated(
        x, params["dw_w"][:, :, None, :], (1, 1), "SAME",
        dimension_numbers=("NHWC", "HWIO", "NHWC"), feature_group_count=c,
        precision=jax.lax.Precision.HIGHEST)
    y = jnp.maximum(y + params["dw_b"], 0.0)
    z = jax.lax.conv_general_dilated(
        y, params["out_w"], (1, 1), "SAME",
        dimension_numbers=("NHWC", "HWIO", "NHWC"),
        precision=jax.lax.Precision.HIGHEST)
    z = jnp.maximum(z + params["out_b"], 0.0)
    return jnp.transpose(z, (0, 3, 1, 2))


if __name__ == "__main__":
    key = jax.random.PRNGKey(0)
    kx, kp = jax.random.split(key)

    N, Cin, H, W = 2, 4, 16, 16
    Cout = 8

    x = jax.random.normal(kx, (N, Cin, H, W), jnp.float32)   # NCHW, like PyTorch
    # bf16-representable input so the kernel's single-pass bf16 MXU path and the f32
    # reference consume identical input values (remaining diff: bf16 activations).
    x = x.astype(jnp.bfloat16).astype(jnp.float32)
    params = make_upsample_params(kp, Cin, Cout, W)

    out = upsample_forward(x, params, scale=2)
    out = jax.block_until_ready(out)

    ref = _ref_forward(x, params, scale=2)
    assert out.shape == (N, Cout, 2 * H, 2 * W), out.shape
    err = float(jnp.max(jnp.abs(out - ref)))
    # Tolerance deliberately loosened vs. the f32 reference to cover the bf16 MXU path.
    assert jnp.allclose(out, ref, rtol=2e-2, atol=2e-2), err

    print("KERNEL_OK")
</pallas_src>

<mosaic_0001>
module attributes {stable_mosaic.version = 11 : i64} {
  func.func @_fused_upsample_kernel(%arg0: i32, %arg1: i32, %arg2: memref<1x20x64xf32, #tpu.memory_space<vmem>>, %arg3: memref<2x128x128xbf16, #tpu.memory_space<vmem>>, %arg4: memref<1x128xf32, #tpu.memory_space<vmem>>, %arg5: memref<384x256xbf16, #tpu.memory_space<vmem>>, %arg6: memref<1x256xf32, #tpu.memory_space<vmem>>, %arg7: memref<1x16x512xf32, #tpu.memory_space<vmem>>) attributes {dimension_semantics = [#tpu.dimension_semantics<parallel>, #tpu.dimension_semantics<parallel>], iteration_bounds = array<i64: 2, 1>, scalar_prefetch = 0 : i64, scratch_operands = 0 : i64, tpu.core_type = #tpu.core_type<tc>, window_params = [{transform_indices = @transform_0, window_bounds = array<i64: 1, 20, 64>}, {pipeline_mode = #tpu.pipeline_mode<synchronous>, transform_indices = @transform_1, window_bounds = array<i64: 2, 128, 128>}, {pipeline_mode = #tpu.pipeline_mode<synchronous>, transform_indices = @transform_2, window_bounds = array<i64: 1, 128>}, {pipeline_mode = #tpu.pipeline_mode<synchronous>, transform_indices = @transform_3, window_bounds = array<i64: 384, 256>}, {pipeline_mode = #tpu.pipeline_mode<synchronous>, transform_indices = @transform_4, window_bounds = array<i64: 1, 256>}, {transform_indices = @transform_5, window_bounds = array<i64: 1, 16, 512>}]} {
    %c16_i32 = arith.constant 16 : i32
    %0 = arith.muli %arg1, %c16_i32 : i32
    %1 = tpu.assume_multiple %0, 16 : i32
    %c0 = arith.constant 0 : index
    %2 = arith.index_cast %1 : i32 to index
    %c0_0 = arith.constant 0 : index
    %3 = vector.load %arg2[%c0, %2, %c0_0] : memref<1x20x64xf32, #tpu.memory_space<vmem>>, vector<1x20x64xf32>
    %4 = vector.shape_cast %3 : vector<1x20x64xf32> to vector<20x64xf32>
    %5 = vector.extract_strided_slice %4 {offsets = [0, 0], sizes = [19, 64], strides = [1, 1]} : vector<20x64xf32> to vector<19x64xf32>
    %6 = vector.extract_strided_slice %4 {offsets = [1, 0], sizes = [19, 64], strides = [1, 1]} : vector<20x64xf32> to vector<19x64xf32>
    %7 = tpu.concatenate %5, %6 in 1 : vector<19x64xf32>, vector<19x64xf32> -> vector<19x128xf32>
    %8 = arith.truncf %7 : vector<19x128xf32> to vector<19x128xbf16>
    %c0_1 = arith.constant 0 : index
    %c0_2 = arith.constant 0 : index
    %9 = vector.load %arg4[%c0_1, %c0_2] : memref<1x128xf32, #tpu.memory_space<vmem>>, vector<1x128xf32>
    %10 = vector.extract_strided_slice %8 {offsets = [0, 0], sizes = [18, 128], strides = [1, 1]} : vector<19x128xbf16> to vector<18x128xbf16>
    %c0_3 = arith.constant 0 : index
    %c0_4 = arith.constant 0 : index
    %c0_5 = arith.constant 0 : index
    %11 = vector.load %arg3[%c0_3, %c0_4, %c0_5] : memref<2x128x128xbf16, #tpu.memory_space<vmem>>, vector<1x128x128xbf16>
    %12 = vector.shape_cast %11 : vector<1x128x128xbf16> to vector<128x128xbf16>
    %cst = arith.constant dense<0.000000e+00> : vector<18x128xf32>
    %13 = tpu.matmul %10, %12, %cst {dimension_numbers = #tpu.dot_dimension_numbers<[1], [0], [0], [1], [0, 0, 1, 1], [], []>} : vector<18x128xbf16>, vector<128x128xbf16>, vector<18x128xf32> -> vector<18x128xf32>
    %14 = vector.broadcast %9 : vector<1x128xf32> to vector<18x128xf32>
    %15 = arith.addf %13, %14 : vector<18x128xf32>
    %16 = vector.extract_strided_slice %8 {offsets = [1, 0], sizes = [18, 128], strides = [1, 1]} : vector<19x128xbf16> to vector<18x128xbf16>
    %c1 = arith.constant 1 : index
    %c0_6 = arith.constant 0 : index
    %c0_7 = arith.constant 0 : index
    %17 = vector.load %arg3[%c1, %c0_6, %c0_7] : memref<2x128x128xbf16, #tpu.memory_space<vmem>>, vector<1x128x128xbf16>
    %18 = vector.shape_cast %17 : vector<1x128x128xbf16> to vector<128x128xbf16>
    %cst_8 = arith.constant dense<0.000000e+00> : vector<18x128xf32>
    %19 = tpu.matmul %16, %18, %cst_8 {dimension_numbers = #tpu.dot_dimension_numbers<[1], [0], [0], [1], [0, 0, 1, 1], [], []>} : vector<18x128xbf16>, vector<128x128xbf16>, vector<18x128xf32> -> vector<18x128xf32>
    %20 = vector.broadcast %9 : vector<1x128xf32> to vector<18x128xf32>
    %21 = arith.addf %19, %20 : vector<18x128xf32>
    %cst_9 = arith.constant 0.000000e+00 : f32
    %22 = vector.broadcast %cst_9 : f32 to vector<18x128xf32>
    %23 = arith.maximumf %15, %22 : vector<18x128xf32>
    %cst_10 = arith.constant 0.000000e+00 : f32
    %24 = vector.broadcast %cst_10 : f32 to vector<18x128xf32>
    %25 = arith.maximumf %21, %24 : vector<18x128xf32>
    %26 = tpu.iota {dimensions = array<i32: 0>} : vector<18x1xi32>
    %c16_i32_11 = arith.constant 16 : i32
    %27 = arith.muli %arg1, %c16_i32_11 : i32
    %c1_i32 = arith.constant 1 : i32
    %28 = arith.subi %27, %c1_i32 : i32
    %29 = vector.broadcast %28 : i32 to vector<18x1xi32>
    %30 = arith.addi %26, %29 : vector<18x1xi32>
    %c0_i32 = arith.constant 0 : i32
    %31 = vector.broadcast %c0_i32 : i32 to vector<18x1xi32>
    %32 = arith.cmpi sge, %30, %31 : vector<18x1xi32>
    %c16_i32_12 = arith.constant 16 : i32
    %33 = vector.broadcast %c16_i32_12 : i32 to vector<18x1xi32>
    %34 = arith.cmpi slt, %30, %33 : vector<18x1xi32>
    %35 = arith.andi %32, %34 : vector<18x1xi1>
    %cst_13 = arith.constant 0.000000e+00 : f32
    %36 = vector.shape_cast %35 : vector<18x1xi1> to vector<18x1xi1>
    %37 = vector.broadcast %36 : vector<18x1xi1> to vector<18x128xi1>
    %38 = vector.broadcast %cst_13 : f32 to vector<18x128xf32>
    %39 = arith.select %37, %23, %38 : vector<18x128xi1>, vector<18x128xf32>
    %40 = arith.truncf %39 : vector<18x128xf32> to vector<18x128xbf16>
    %cst_14 = arith.constant 0.000000e+00 : f32
    %41 = vector.shape_cast %35 : vector<18x1xi1> to vector<18x1xi1>
    %42 = vector.broadcast %41 : vector<18x1xi1> to vector<18x128xi1>
    %43 = vector.broadcast %cst_14 : f32 to vector<18x128xf32>
    %44 = arith.select %42, %25, %43 : vector<18x128xi1>, vector<18x128xf32>
    %45 = arith.truncf %44 : vector<18x128xf32> to vector<18x128xbf16>
    %c0_15 = arith.constant 0 : index
    %c0_16 = arith.constant 0 : index
    %46 = vector.load %arg5[%c0_15, %c0_16] : memref<384x256xbf16, #tpu.memory_space<vmem>>, vector<384x256xbf16>
    %c0_17 = arith.constant 0 : index
    %c0_18 = arith.constant 0 : index
    %47 = vector.load %arg6[%c0_17, %c0_18] : memref<1x256xf32, #tpu.memory_space<vmem>>, vector<1x256xf32>
    %48 = vector.extract_strided_slice %45 {offsets = [0, 0], sizes = [16, 128], strides = [1, 1]} : vector<18x128xbf16> to vector<16x128xbf16>
    %49 = vector.extract_strided_slice %40 {offsets = [1, 0], sizes = [16, 128], strides = [1, 1]} : vector<18x128xbf16> to vector<16x128xbf16>
    %50 = vector.extract_strided_slice %45 {offsets = [1, 0], sizes = [16, 128], strides = [1, 1]} : vector<18x128xbf16> to vector<16x128xbf16>
    %51 = tpu.concatenate %48, %49, %50 in 1 : vector<16x128xbf16>, vector<16x128xbf16>, vector<16x128xbf16> -> vector<16x384xbf16>
    %52 = vector.extract_strided_slice %40 {offsets = [1, 0], sizes = [16, 128], strides = [1, 1]} : vector<18x128xbf16> to vector<16x128xbf16>
    %53 = vector.extract_strided_slice %45 {offsets = [1, 0], sizes = [16, 128], strides = [1, 1]} : vector<18x128xbf16> to vector<16x128xbf16>
    %54 = vector.extract_strided_slice %40 {offsets = [2, 0], sizes = [16, 128], strides = [1, 1]} : vector<18x128xbf16> to vector<16x128xbf16>
    %55 = tpu.concatenate %52, %53, %54 in 1 : vector<16x128xbf16>, vector<16x128xbf16>, vector<16x128xbf16> -> vector<16x384xbf16>
    %cst_19 = arith.constant dense<0.000000e+00> : vector<16x256xf32>
    %56 = tpu.matmul %51, %46, %cst_19 {dimension_numbers = #tpu.dot_dimension_numbers<[1], [0], [0], [1], [0, 0, 1, 1], [], []>} : vector<16x384xbf16>, vector<384x256xbf16>, vector<16x256xf32> -> vector<16x256xf32>
    %57 = vector.broadcast %47 : vector<1x256xf32> to vector<16x256xf32>
    %58 = arith.addf %56, %57 : vector<16x256xf32>
    %cst_20 = arith.constant dense<0.000000e+00> : vector<16x256xf32>
    %59 = tpu.matmul %55, %46, %cst_20 {dimension_numbers = #tpu.dot_dimension_numbers<[1], [0], [0], [1], [0, 0, 1, 1], [], []>} : vector<16x384xbf16>, vector<384x256xbf16>, vector<16x256xf32> -> vector<16x256xf32>
    %60 = vector.broadcast %47 : vector<1x256xf32> to vector<16x256xf32>
    %61 = arith.addf %59, %60 : vector<16x256xf32>
    %cst_21 = arith.constant 0.000000e+00 : f32
    %62 = vector.broadcast %cst_21 : f32 to vector<16x256xf32>
    %63 = arith.maximumf %58, %62 : vector<16x256xf32>
    %c0_22 = arith.constant 0 : index
    %c0_23 = arith.constant 0 : index
    %c0_24 = arith.constant 0 : index
    %64 = vector.load %arg7[%c0_22, %c0_23, %c0_24] : memref<1x16x512xf32, #tpu.memory_space<vmem>>, vector<1x16x256xf32>
    %65 = vector.shape_cast %64 : vector<1x16x256xf32> to vector<16x256xf32>
    %66 = vector.shape_cast %63 : vector<16x256xf32> to vector<1x16x256xf32>
    tpu.vector_store %arg7[%c0_22, %c0_23, %c0_24], %66 {strides = array<i32>} : memref<1x16x512xf32, #tpu.memory_space<vmem>>, vector<1x16x256xf32>,
    %cst_25 = arith.constant 0.000000e+00 : f32
    %67 = vector.broadcast %cst_25 : f32 to vector<16x256xf32>
    %68 = arith.maximumf %61, %67 : vector<16x256xf32>
    %c0_26 = arith.constant 0 : index
    %c0_27 = arith.constant 0 : index
    %c256 = arith.constant 256 : index
    %69 = vector.load %arg7[%c0_26, %c0_27, %c256] : memref<1x16x512xf32, #tpu.memory_space<vmem>>, vector<1x16x256xf32>
    %70 = vector.shape_cast %69 : vector<1x16x256xf32> to vector<16x256xf32>
    %71 = vector.shape_cast %68 : vector<16x256xf32> to vector<1x16x256xf32>
    tpu.vector_store %arg7[%c0_26, %c0_27, %c256], %71 {strides = array<i32>} : memref<1x16x512xf32, #tpu.memory_space<vmem>>, vector<1x16x256xf32>,
    return
  }
  func.func @transform_0(%arg0: i32, %arg1: i32) -> (i32, i32, i32) {
    %c0_i32 = arith.constant 0 : i32
    %c0_i32_0 = arith.constant 0 : i32
    %c0_i32_1 = arith.constant 0 : i32
    return %arg0, %c0_i32, %c0_i32_0 : i32, i32, i32
  }
  func.func @transform_1(%arg0: i32, %arg1: i32) -> (i32, i32, i32) {
    %c0_i32 = arith.constant 0 : i32
    %c0_i32_0 = arith.constant 0 : i32
    %c0_i32_1 = arith.constant 0 : i32
    %c0_i32_2 = arith.constant 0 : i32
    return %c0_i32, %c0_i32_0, %c0_i32_1 : i32, i32, i32
  }
  func.func @transform_2(%arg0: i32, %arg1: i32) -> (i32, i32) {
    %c0_i32 = arith.constant 0 : i32
    %c0_i32_0 = arith.constant 0 : i32
    %c0_i32_1 = arith.constant 0 : i32
    return %c0_i32, %c0_i32_0 : i32, i32
  }
  func.func @transform_3(%arg0: i32, %arg1: i32) -> (i32, i32) {
    %c0_i32 = arith.constant 0 : i32
    %c0_i32_0 = arith.constant 0 : i32
    %c0_i32_1 = arith.constant 0 : i32
    return %c0_i32, %c0_i32_0 : i32, i32
  }
  func.func @transform_4(%arg0: i32, %arg1: i32) -> (i32, i32) {
    %c0_i32 = arith.constant 0 : i32
    %c0_i32_0 = arith.constant 0 : i32
    %c0_i32_1 = arith.constant 0 : i32
    return %c0_i32, %c0_i32_0 : i32, i32
  }
  func.func @transform_5(%arg0: i32, %arg1: i32) -> (i32, i32, i32) {
    %c0_i32 = arith.constant 0 : i32
    %c0_i32_0 = arith.constant 0 : i32
    return %arg0, %arg1, %c0_i32 : i32, i32, i32
  }
}

</mosaic_0001>

<bundles_post_ra>
// kernel: upsample_forward.1
= control target key start
LH: loop header
LB: loop body
LE: loop exit
PB: predicated region body
PF: predicated region fallthrough
CT: control target
= control target key end

     0   :  { %10 = vsyncpa [#allocation3], 0  ;;  %s1643_s18 = smov 0   ;;  %s1645_s19 = smov 0   ;;  %s2200_s0 = inlined_call_operand.vmem [shape: f32[2,20,64], index: 0, kind: input, shape index: {}]   ;;  %s2201_s1 = inlined_call_operand.hbm [shape: bf16[2,128,128], index: 1, kind: input, shape index: {}]   ;;  %s2202_s2 = inlined_call_operand.vmem [shape: f32[1,128], index: 2, kind: input, shape index: {}]   ;;  %s2203_s3 = inlined_call_operand.vmem [shape: bf16[384,256], index: 3, kind: input, shape index: {}]   ;;  %s2204_s4 = inlined_call_operand.vmem [shape: f32[1,256], index: 4, kind: input, shape index: {}]   ;;  %s2205_s5 = inlined_call_operand.vmem [shape: f32[2,16,512], index: 5, kind: output, shape index: {}]  }
   0x1   :  { %s1647_s20 = smov 0  }
   0x2 LB: > { %s1173_s21 = sadd.s32 4294967295, %s1607_s20   ;;  %s28_s22 = sadd.s32 1, %s1603_s19  ;;  %s1607_s20 = sphi %s1647_s20, %s16_s20   ;;  %s1603_s19 = sphi %s1645_s19, %s2207_s19   ;;  %s1599_s18 = sphi %s1643_s18, %s2206_s18  }
   0x3   : > { %p30_p0 = scmp.ge.s32.totalorder %s28_s22, 2  ;;  %p1175_p1 = scmp.ge.s32.totalorder %s1607_s20, 1 }
   0x4   : > { %p171_p2 = scmp.lt.s32.totalorder %s1607_s20, 3  ;;  %p1515_p4 = scmp.eq.s32.totalorder %s1173_s21, 0 }
   0x5   : > { %s2209_s22 = smov (%p30_p0, %s28_s22), 0  ;;  %s182_s25 = sshll.u32 %s2201_s1, 4  ;;  %s183_s25 = int_to_ptr.hbm [resolvable:$true] %s182_s25 }
   0x6   : > { %p172_p3 = pnand %p1175_p1, %p171_p2  ;;  %s1609_s26 = smov [#allocation2]  }
   0x7   : > { %s184_s27 = sshll.u32 %s1609_s26, 4  ;;  %s1610_s28 = smov 64   ;;  %s185_s27 = int_to_ptr.vmem [resolvable:$true] %s184_s27 }
   0x8   : > { %p1511_p5 = pneg %p172_p3  ;;  %s1611_s29 = smov 4  }
   0x9   : > { %217 = sbr.rel (%p172_p3) target bundleno = 493 (0x1ed), region = 40 }
   0xa   : > { %p1512_p6 = pnand %p1515_p4, %p1511_p5 }
   0xc   : > { %1514 = dma.hbm_to_vmem [thread:$0]  (!%p1512_p6), %s183_s25, 2048, %s185_s27, [#allocation3], %s1610_s28, %s1610_s28, %s1611_s29  }
   0xe   : > { %1594 = dma.done.wait (%p1515_p4), [#allocation3], 2048  }
   0xf   : > { %1596 = vsyncadd (%p1515_p4), [#allocation3], 4294965248  ;;  %p251_p7 = scmp.lt.s32.totalorder %s1599_s18, 1  ;;  %vm275_vm0 = vcmask 1046528   ;;  %v1449_v6 = vld [vmem:[#allocation2 + $0x38] sm:$0xff]  ;;  %v1448_v10 = vld [vmem:[#allocation2 + $0x30] sm:$0xff] }
  0x10   : > { %v1457_v7 = vld [vmem:[#allocation2 + $0x78] sm:$0xff]  ;;  %375 = vmatpush.bf16.msra.mxu0 %v1449_v6  ;;  %v1456_v12 = vld [vmem:[#allocation2 + $0x70] sm:$0xff]  ;;  %s1612_s9 = smov 64   ;;  %v1447_v13 = vld [vmem:[#allocation2 + $0x28] sm:$0xff]  ;;  %vm290_vm1 = vcmask 523264  }
  0x11   : > { %s2211_s18 = smov (!%p251_p7, %s1599_s18), 1  ;;  %476 = vmatpush.bf16.msra.mxu1 %v1457_v7  ;;  %v1455_v14 = vld [vmem:[#allocation2 + $0x68] sm:$0xff]  ;;  %v1446_v15 = vld [vmem:[#allocation2 + $0x20] sm:$0xff]  ;;  %v1445_v16 = vld [vmem:[#allocation2 + $0x18] sm:$0xff]  ;;  %vm410_vm2 = vsmask.f32 7424 }
  0x12   : > { %s1506_s30 = smul.u32 24, %s2211_s18  ;;  %v1444_v17 = vld [vmem:[#allocation2 + $0x10] sm:$0xff]  ;;  %v1454_v18 = vld [vmem:[#allocation2 + $0x60] sm:$0xff]  ;;  %v1443_v19 = vld [vmem:[#allocation2 + $0x8] sm:$0xff]  ;;  %s1441_s17 = sshll.u32 %s2211_s18, 6 }
  0x13   : > { %v1453_v20 = vld [vmem:[#allocation2 + $0x58] sm:$0xff]  ;;  %v1442_v21 = vld [vmem:[#allocation2] sm:$0xff]  ;;  %v1452_v22 = vld [vmem:[#allocation2 + $0x50] sm:$0xff]  ;;  %s2181_s24 = scalar_lea.vmem %s2205_s5, %s1441_s17 }
  0x14   : > { %s255_s8 = scalar_lea.vmem %s2200_s0, %s1506_s30  ;;  %376 = vmatpush.bf16.msra.mxu0 %v1448_v10  ;;  %v1451_v23 = vld [vmem:[#allocation2 + $0x48] sm:$0xff]  ;;  %v1450_v24 = vld [vmem:[#allocation2 + $0x40] sm:$0xff]  ;;  %v1305_v32 = vld [vmem:[%s2203_s3 + $0x70] sm:$0xf] }
  0x15   : > { %v269_v0 = vld [vmem:[%s255_s8] sm:$0xff]  ;;  %v270_v1 = vld [vmem:[%s255_s8 + $0x8] sm:$0xff]  ;;  %v1671_v2 = vld [vmem:[%s255_s8 + $0x10] sm:$0xf]  ;;  %477 = vmatpush.bf16.msra.mxu1 %v1456_v12 }
  0x16   : > { %v276_v3 = vrot.slane %v269_v0, 1  ;;  %v277_v4 = vrot.slane %v270_v1, 1  ;;  %v279_v5 = vrot.slane %v1671_v2, 1  ;;  %v1473_v33 = vld [vmem:[%s2203_s3 + $0x74] sm:$0xf0] }
  0x17   : > { %v1472_v34 = vld [vmem:[%s2203_s3 + $0x74] sm:$0xf]  ;;  %v1685_v37 = vor.u32 %v1473_v33, %v1305_v32  ;;  %v1307_v38 = vld [vmem:[%s2203_s3 + $0x78] sm:$0xf0]  ;;  %v1369_v39 = vld [vmem:[%s2203_s3 + $0xf0] sm:$0xf] }
  0x18   : > { %v278_v8 = vsel %vm275_vm0, %v276_v3, %v277_v4  ;;  %v280_v9 = vsel %vm275_vm0, %v277_v4, %v279_v5  ;;  %377 = vmatpush.bf16.msra.mxu0 %v1447_v13  ;;  %v1489_v40 = vld [vmem:[%s2203_s3 + $0xf4] sm:$0xf0]  ;;  %v1696_v41 = vor.u32 %v1472_v34, %v1307_v38  ;;  %v1297_v43 = vld [vmem:[%s2203_s3 + $0x60] sm:$0xf]  ;;  %v1471_v44 = vld [vmem:[%s2203_s3 + $0x64] sm:$0xf0] }
  0x19   : > { %v1545_v11 = vpack.i.bf16 %v280_v9, %v278_v8  ;;  %478 = vmatpush.bf16.msra.mxu1 %v1455_v14  ;;  %v1698_v42 = vor.u32 %v1489_v40, %v1369_v39  ;;  %v1470_v45 = vld [vmem:[%s2203_s3 + $0x64] sm:$0xf]  ;;  %875 = vmatpush.bf16.msra.mxu2 %v1685_v37  ;;  %v1710_v48 = vor.u32 %v1471_v44, %v1297_v43  ;;  %v1299_v49 = vld [vmem:[%s2203_s3 + $0x68] sm:$0xf0]  ;;  %v1361_v50 = vld [vmem:[%s2203_s3 + $0xe0] sm:$0xf] }
  0x1a   : > { %v1487_v51 = vld [vmem:[%s2203_s3 + $0xe4] sm:$0xf0]  ;;  %v1725_v53 = vor.u32 %v1470_v45, %v1299_v49  ;;  %v1289_v55 = vld [vmem:[%s2203_s3 + $0x50] sm:$0xf]  ;;  %v1469_v56 = vld [vmem:[%s2203_s3 + $0x54] sm:$0xf0] }
  0x1b   : > { %1546 = vrot.lane.b32.xlu0 %v1545_v11, %s1612_s9  ;;  %889 = vmatpush.bf16.msra.mxu3 %v1698_v42  ;;  %v1727_v54 = vor.u32 %v1487_v51, %v1361_v50  ;;  %v1468_v57 = vld [vmem:[%s2203_s3 + $0x54] sm:$0xf]  ;;  %v1291_v60 = vld [vmem:[%s2203_s3 + $0x58] sm:$0xf0]  ;;  %v1353_v61 = vld [vmem:[%s2203_s3 + $0xd0] sm:$0xf] }
  0x1c   : > { %378 = vmatpush.bf16.msra.mxu0 %v1446_v15  ;;  %v1485_v62 = vld [vmem:[%s2203_s3 + $0xd4] sm:$0xf0]  ;;  %v1467_v4 = vld [vmem:[%s2203_s3 + $0x44] sm:$0xf0]  ;;  %v1345_v10 = vld [vmem:[%s2203_s3 + $0xc0] sm:$0xf] }
  0x1d   : > { %479 = vmatpush.bf16.msra.mxu1 %v1454_v18  ;;  %876 = vmatpush.bf16.msra.mxu2 %v1710_v48  ;;  %v1757_v3 = vor.u32 %v1485_v62, %v1353_v61  ;;  %v1505_v6 = vld [vmem:[%s2203_s3 + $0x174] sm:$0xf0]  ;;  %v1483_v11 = vld [vmem:[%s2203_s3 + $0xc4] sm:$0xf0]  ;;  %v1466_v12 = vld [vmem:[%s2203_s3 + $0x44] sm:$0xf] }
  0x1e   : > { %v1283_v13 = vld [vmem:[%s2203_s3 + $0x48] sm:$0xf0]  ;;  %v1425_v14 = vld [vmem:[%s2203_s3 + $0x160] sm:$0xf]  ;;  %v1503_v18 = vld [vmem:[%s2203_s3 + $0x164] sm:$0xf0] }
  0x1f   : > { %890 = vmatpush.bf16.msra.mxu3 %v1727_v54  ;;  %v1463_v38 = vld [vmem:[%s2203_s3 + $0x24] sm:$0xf0]  ;;  %v1409_v39 = vld [vmem:[%s2203_s3 + $0x140] sm:$0xf] }
  0x20   : > { %379 = vmatpush.bf16.msra.mxu0 %v1445_v16  ;;  %v1329_v43 = vld [vmem:[%s2203_s3 + $0xa0] sm:$0xf]  ;;  %v1479_v44 = vld [vmem:[%s2203_s3 + $0xa4] sm:$0xf0] }
  0x21   : > { %480 = vmatpush.bf16.msra.mxu1 %v1453_v20  ;;  %v1273_v20 = vld [vmem:[%s2203_s3 + $0x30] sm:$0xf]  ;;  %v1499_v45 = vld [vmem:[%s2203_s3 + $0x144] sm:$0xf0]  ;;  %v1871_v51 = vor.u32 %v1479_v44, %v1329_v43  ;;  %v1484_v43 = vld [vmem:[%s2203_s3 + $0xd4] sm:$0xf] }
  0x22   : > { %v1868_v50 = vor.u32 %v1499_v45, %v1409_v39  ;;  %v1355_v44 = vld [vmem:[%s2203_s3 + $0xd8] sm:$0xf0] }
  0x23   : > { %285 = vrot.lane.b32.xlu0 %v279_v5, %s1612_s9  ;;  %v1433_v5 = vld [vmem:[%s2203_s3 + $0x170] sm:$0xf]  ;;  %891 = vmatpush.bf16.msra.mxu3 %v1757_v3  ;;  %v1997_v45 = vor.u32 %v1484_v43, %v1355_v44  ;;  %v1550_v44 = vld [vmem:[%s2202_s2] ss:$0 sm:$0xff] }
  0x24   : > { %380 = vmatpush.bf16.msra.mxu0 %v1444_v17  ;;  %v1770_v9 = vor.u32 %v1505_v6, %v1433_v5  ;;  %v1249_v5 = vld [vmem:[%s2203_s3] sm:$0xf]  ;;  %v1459_v6 = vld [vmem:[%s2203_s3 + $0x4] sm:$0xf0] }
  0x25   : > { %481 = vmatpush.bf16.msra.mxu1 %v1452_v22  ;;  %v1464_v22 = vld [vmem:[%s2203_s3 + $0x34] sm:$0xf] }
  0x28   : > { %381 = vmatpush.bf16.msra.mxu0 %v1443_v19  ;;  %v1797_v19 = vor.u32 %v1483_v11, %v1345_v10  ;;  %v1251_v10 = vld [vmem:[%s2203_s3 + $0x8] sm:$0xf0]  ;;  %v1488_v11 = vld [vmem:[%s2203_s3 + $0xf4] sm:$0xf] }
  0x29   : > { %482 = vmatpush.bf16.msra.mxu1 %v1451_v23  ;;  %v1808_v23 = vor.u32 %v1503_v18, %v1425_v14 }
  0x2a   : > { %892 = vmatpush.bf16.msra.mxu3 %v1797_v19 }
  0x2c   : > { %382 = vmatpush.bf16.msra.mxu0 %v1442_v21  ;;  %v1465_v21 = vld [vmem:[%s2203_s3 + $0x34] sm:$0xf0] }
  0x2d   : > { %483 = vmatpush.bf16.msra.mxu1 %v1450_v24  ;;  %v1829_v33 = vor.u32 %v1465_v21, %v1273_v20  ;;  %v1313_v20 = vld [vmem:[%s2203_s3 + $0x80] sm:$0xf]  ;;  %v1475_v21 = vld [vmem:[%s2203_s3 + $0x84] sm:$0xf0] }
  0x30   : > { %903 = vmatpush.bf16.msrb.mxu0 %v1770_v9 }
  0x31   : > { %917 = vmatpush.bf16.msrb.mxu1 %v1696_v41 }
  0x34   : > { %904 = vmatpush.bf16.msrb.mxu0 %v1808_v23 }
  0x35   : > { %918 = vmatpush.bf16.msrb.mxu1 %v1725_v53 }
  0x8d   : > { %v1547_v25 = vpop.permute.xlu0 %1546 }
  0x8e   : > { %v1549_v26 = vunpack.i.h.bf16 %v1547_v25  ;;  %v1548_v27 = vunpack.i.l.bf16 %v1547_v25 }
  0x90   : > { %v291_v28 = vsel %vm290_vm1, %v269_v0, %v1548_v27  ;;  %v292_v29 = vsel %vm290_vm1, %v270_v1, %v1549_v26  ;;  %v1748_v0 = vor.u32 %v1469_v56, %v1289_v55  ;;  %v1281_v1 = vld [vmem:[%s2203_s3 + $0x40] sm:$0xf]  ;;  %v1810_v26 = vor.u32 %v1466_v12, %v1283_v13  ;;  %v1337_v27 = vld [vmem:[%s2203_s3 + $0xb0] sm:$0xf]  ;;  %v1461_v55 = vld [vmem:[%s2203_s3 + $0x14] sm:$0xf0] }
  0x91   : > { %v294_v30 = vpack.c.bf16 %v291_v28, %v291_v28  ;;  %v295_v31 = vpack.c.bf16 %v292_v29, %v292_v29  ;;  %v1789_v17 = vor.u32 %v1467_v4, %v1281_v1  ;;  %v1481_v28 = vld [vmem:[%s2203_s3 + $0xb4] sm:$0xf0]  ;;  %v1275_v29 = vld [vmem:[%s2203_s3 + $0x38] sm:$0xf0] }
  0x92   : > { %877 = vmatpush.bf16.msra.mxu2 %v1748_v0  ;;  %v1847_v40 = vor.u32 %v1464_v22, %v1275_v29  ;;  %v1477_v1 = vld [vmem:[%s2203_s3 + $0x94] sm:$0xf0]  ;;  %v1371_v12 = vld [vmem:[%s2203_s3 + $0xf8] sm:$0xf0]  ;;  %v1950_v22 = vor.u32 %v1475_v21, %v1313_v20  ;;  %v1363_v29 = vld [vmem:[%s2203_s3 + $0xe8] sm:$0xf0] }
  0x93   : > { %v320_v35 = vunpack.c.l.b16 %v294_v30  ;;  %v321_v36 = vunpack.c.l.b16 %v295_v31  ;;  %v1417_v30 = vld [vmem:[%s2203_s3 + $0x150] sm:$0xf]  ;;  %v1501_v31 = vld [vmem:[%s2203_s3 + $0x154] sm:$0xf0]  ;;  %v1931_v14 = vor.u32 %v1488_v11, %v1371_v12  ;;  %v1339_v11 = vld [vmem:[%s2203_s3 + $0xb8] sm:$0xf0] }
  0x94   : > { %v1832_v34 = vor.u32 %v1501_v31, %v1417_v30  ;;  %v1495_v31 = vld [vmem:[%s2203_s3 + $0x124] sm:$0xf0]  ;;  %v1331_v20 = vld [vmem:[%s2203_s3 + $0xa8] sm:$0xf0] }
  0x95   : > { %v286_v46 = vpop.permute.xlu0 %285  ;;  %v323_v47 = vpack.c.b16 %v321_v36, %v320_v35  ;;  %v1835_v35 = vor.u32 %v1481_v28, %v1337_v27  ;;  %v1265_v36 = vld [vmem:[%s2203_s3 + $0x20] sm:$0xf]  ;;  %v1486_v28 = vld [vmem:[%s2203_s3 + $0xe4] sm:$0xf] }
  0x96   : > { %v293_v52 = vsel %vm290_vm1, %v1671_v2, %v286_v46  ;;  %v1755_v2 = vor.u32 %v1468_v57, %v1291_v60  ;;  %878 = vmatpush.bf16.msra.mxu2 %v1789_v17  ;;  %v1462_v46 = vld [vmem:[%s2203_s3 + $0x24] sm:$0xf]  ;;  %v1865_v49 = vor.u32 %v1463_v38, %v1265_v36  ;;  %905 = vmatpush.bf16.msrb.mxu0 %v1832_v34  ;;  %v1460_v57 = vld [vmem:[%s2203_s3 + $0x14] sm:$0xf]  ;;  %v1427_v38 = vld [vmem:[%s2203_s3 + $0x168] sm:$0xf0] }
  0x97   : > { %v296_v58 = vpack.c.bf16 %v293_v52, %v293_v52  ;;  %383 = vmatmul.bf16.vlgmr.msra.gmra.mxu0 %v323_v47  ;;  %v414_v59 = vshll.u32 %v323_v47, 16  ;;  %v412_v15 = vshrl.u32 %v323_v47, 16  ;;  %v1267_v47 = vld [vmem:[%s2203_s3 + $0x28] sm:$0xf0]  ;;  %893 = vmatpush.bf16.msra.mxu3 %v1835_v35  ;;  %v1257_v52 = vld [vmem:[%s2203_s3 + $0x10] sm:$0xf]  ;;  %v1969_v30 = vor.u32 %v1486_v28, %v1363_v29 }
  0x98   : > { %919 = vmatpush.bf16.msrb.mxu1 %v1755_v2  ;;  %v1881_v56 = vor.u32 %v1462_v46, %v1267_v47  ;;  %v1502_v36 = vld [vmem:[%s2203_s3 + $0x164] sm:$0xf]  ;;  %v1385_v46 = vld [vmem:[%s2203_s3 + $0x110] sm:$0xf]  ;;  %v1323_v28 = vld [vmem:[%s2203_s3 + $0x98] sm:$0xf0] }
  0x99   : > { %v322_v63 = vunpack.c.l.b16 %v296_v58  ;;  %v416_v8 = vrot.slane %v414_v59, 1  ;;  %v1259_v58 = vld [vmem:[%s2203_s3 + $0x18] sm:$0xf0]  ;;  %v1890_v59 = vor.u32 %v1461_v55, %v1257_v52  ;;  %v1989_v39 = vor.u32 %v1502_v36, %v1427_v38  ;;  %v1500_v52 = vld [vmem:[%s2203_s3 + $0x154] sm:$0xf] }
  0x9a   : > { %879 = vmatpush.bf16.msra.mxu2 %v1829_v33  ;;  %906 = vmatpush.bf16.msrb.mxu0 %v1868_v50  ;;  %v1895_v60 = vor.u32 %v1460_v57, %v1259_v58  ;;  %v1419_v55 = vld [vmem:[%s2203_s3 + $0x158] sm:$0xf0]  ;;  %v1482_v58 = vld [vmem:[%s2203_s3 + $0xc4] sm:$0xf]  ;;  %v1315_v38 = vld [vmem:[%s2203_s3 + $0x88] sm:$0xf0] }
  0x9b   : > { %v1768_v7 = vpack.c.b16 %v322_v63, %v322_v63  ;;  %v417_v24 = vor.u32 %v416_v8, %v412_v15  ;;  %894 = vmatpush.bf16.msra.mxu3 %v1871_v51  ;;  %v1321_v63 = vld [vmem:[%s2203_s3 + $0x90] sm:$0xf]  ;;  %v1917_v8 = vor.u32 %v1459_v6, %v1249_v5  ;;  %v2017_v57 = vor.u32 %v1500_v52, %v1419_v55  ;;  %v1498_v5 = vld [vmem:[%s2203_s3 + $0x144] sm:$0xf]  ;;  %v1411_v6 = vld [vmem:[%s2203_s3 + $0x148] sm:$0xf0] }
  0x9c   : > { %920 = vmatpush.bf16.msrb.mxu1 %v1810_v26  ;;  %v1906_v4 = vor.u32 %v1477_v1, %v1321_v63  ;;  %v1401_v15 = vld [vmem:[%s2203_s3 + $0x130] sm:$0xf]  ;;  %v1377_v63 = vld [vmem:[%s2203_s3 + $0x100] sm:$0xf] }
  0x9d   : > { %v419_v16 = vshll.u32 %v1768_v7, 16  ;;  %v423_v61 = vshrl.u32 %v1768_v7, 16 }
  0x9e   : > { %880 = vmatpush.bf16.msra.mxu2 %v1865_v49 }
  0x9f   : > { %v421_v25 = vrot.slane %v419_v16, 1  ;;  %895 = vmatpush.bf16.msra.mxu3 %v1906_v4  ;;  %v1497_v16 = vld [vmem:[%s2203_s3 + $0x134] sm:$0xf0] }
  0xa0   : > { %921 = vmatpush.bf16.msrb.mxu1 %v1847_v40  ;;  %v1940_v18 = vor.u32 %v1497_v16, %v1401_v15  ;;  %v1403_v15 = vld [vmem:[%s2203_s3 + $0x138] sm:$0xf0] }
  0xa1   : > { %v422_v32 = vsel %vm410_vm2, %v417_v24, %v421_v25  ;;  %v425_v62 = vor.u32 %v423_v61, %v421_v25  ;;  %v1504_v24 = vld [vmem:[%s2203_s3 + $0x174] sm:$0xf]  ;;  %v1435_v25 = vld [vmem:[%s2203_s3 + $0x178] sm:$0xf0]  ;;  %v1347_v61 = vld [vmem:[%s2203_s3 + $0xc8] sm:$0xf0] }
  0xa2   : > { %484 = vmatmul.bf16.vlgmr.msra.gmra.mxu1 %v422_v32  ;;  %881 = vmatpush.bf16.msra.mxu2 %v1890_v59  ;;  %v1960_v27 = vor.u32 %v1504_v24, %v1435_v25  ;;  %v1395_v24 = vld [vmem:[%s2203_s3 + $0x128] sm:$0xf0] }
  0xa3   : > { %907 = vmatpush.bf16.msrb.mxu0 %v1940_v18  ;;  %896 = vmatpush.bf16.msra.mxu3 %v1950_v22 }
  0xa4   : > { %922 = vmatpush.bf16.msrb.mxu1 %v1881_v56 }
  0xa6   : > { %882 = vmatpush.bf16.msra.mxu2 %v1917_v8 }
  0xa7   : > { %388 = vmatmul.bf16.gmra.mxu0 %v1768_v7  ;;  %v1458_v7 = vld [vmem:[%s2203_s3 + $0x4] sm:$0xf]  ;;  %945 = vmatpush.bf16.msrb.mxu3 %v1960_v27 }
  0xa8   : > { %923 = vmatpush.bf16.msrb.mxu1 %v1895_v60  ;;  %v1929_v13 = vor.u32 %v1458_v7, %v1251_v10  ;;  %v2045_v7 = vor.u32 %v1498_v5, %v1411_v6  ;;  %v1480_v10 = vld [vmem:[%s2203_s3 + $0xb4] sm:$0xf] }
  0xa9   : > { %v2054_v12 = vor.u32 %v1480_v10, %v1339_v11 }
  0xaa   : > { %931 = vmatpush.bf16.msrb.mxu2 %v1931_v14 }
  0xab   : > { %946 = vmatpush.bf16.msrb.mxu3 %v1989_v39 }
  0xac   : > { %924 = vmatpush.bf16.msrb.mxu1 %v1929_v13 }
  0xae   : > { %932 = vmatpush.bf16.msrb.mxu2 %v1969_v30 }
  0xaf   : > { %947 = vmatpush.bf16.msrb.mxu3 %v2017_v57 }
  0xb0   : > { %986 = vmatpush.bf16.msra.mxu1 %v1698_v42  ;;  %v1393_v42 = vld [vmem:[%s2203_s3 + $0x120] sm:$0xf] }
  0xb1   : > { %v1978_v32 = vor.u32 %v1495_v31, %v1393_v42  ;;  %v500_v42 = vlaneseq  ;;  %v1387_v31 = vld [vmem:[%s2203_s3 + $0x118] sm:$0xf0] }
  0xb2   : > { %489 = vmatmul.bf16.gmra.mxu1 %v425_v62  ;;  %933 = vmatpush.bf16.msrb.mxu2 %v1997_v45  ;;  %v2025_v62 = vor.u32 %v1482_v58, %v1347_v61 }
  0xb3   : > { %908 = vmatpush.bf16.msrb.mxu0 %v1978_v32  ;;  %948 = vmatpush.bf16.msrb.mxu3 %v2045_v7 }
  0xb4   : > { %987 = vmatpush.bf16.msra.mxu1 %v1727_v54  ;;  %v1493_v54 = vld [vmem:[%s2203_s3 + $0x114] sm:$0xf0] }
  0xb5   : > { %v2006_v47 = vor.u32 %v1493_v54, %v1385_v46  ;;  %v1490_v46 = vld [vmem:[%s2203_s3 + $0x104] sm:$0xf]  ;;  %v1379_v54 = vld [vmem:[%s2203_s3 + $0x108] sm:$0xf0] }
  0xb6   : > { %934 = vmatpush.bf16.msrb.mxu2 %v2025_v62 }
  0xb7   : > { %909 = vmatpush.bf16.msrb.mxu0 %v2006_v47 }
  0xb8   : > { %988 = vmatpush.bf16.msra.mxu1 %v1757_v3  ;;  %v1491_v3 = vld [vmem:[%s2203_s3 + $0x104] sm:$0xf0] }
  0xb9   : > { %v2034_v1 = vor.u32 %v1491_v3, %v1377_v63 }
  0xba   : > { %935 = vmatpush.bf16.msrb.mxu2 %v2054_v12 }
  0xbb   : > { %910 = vmatpush.bf16.msrb.mxu0 %v2034_v1 }
  0xbc   : > { %989 = vmatpush.bf16.msra.mxu1 %v1797_v19  ;;  %v1496_v19 = vld [vmem:[%s2203_s3 + $0x134] sm:$0xf] }
  0xbd   : > { %v2065_v16 = vor.u32 %v1496_v19, %v1403_v15 }
  0xbf   : > { %972 = vmatpush.bf16.msra.mxu0 %v1685_v37  ;;  %v1478_v37 = vld [vmem:[%s2203_s3 + $0xa4] sm:$0xf]  ;;  %949 = vmatpush.bf16.msrb.mxu3 %v2065_v16 }
  0xc0   : > { %990 = vmatpush.bf16.msra.mxu1 %v1835_v35  ;;  %v2074_v21 = vor.u32 %v1478_v37, %v1331_v20  ;;  %v1494_v35 = vld [vmem:[%s2203_s3 + $0x124] sm:$0xf] }
  0xc1   : > { %v2085_v25 = vor.u32 %v1494_v35, %v1395_v24 }
  0xc2   : > { %936 = vmatpush.bf16.msrb.mxu2 %v2074_v21 }
  0xc3   : > { %973 = vmatpush.bf16.msra.mxu0 %v1710_v48  ;;  %v1476_v48 = vld [vmem:[%s2203_s3 + $0x94] sm:$0xf]  ;;  %950 = vmatpush.bf16.msrb.mxu3 %v2085_v25 }
  0xc4   : > { %991 = vmatpush.bf16.msra.mxu1 %v1871_v51  ;;  %v2094_v29 = vor.u32 %v1476_v48, %v1323_v28  ;;  %v1492_v51 = vld [vmem:[%s2203_s3 + $0x114] sm:$0xf] }
  0xc5   : > { %v2105_v36 = vor.u32 %v1492_v51, %v1387_v31 }
  0xc6   : > { %937 = vmatpush.bf16.msrb.mxu2 %v2094_v29 }
  0xc7   : > { %974 = vmatpush.bf16.msra.mxu0 %v1748_v0  ;;  %v1474_v0 = vld [vmem:[%s2203_s3 + $0x84] sm:$0xf]  ;;  %951 = vmatpush.bf16.msrb.mxu3 %v2105_v36 }
  0xc8   : > { %992 = vmatpush.bf16.msra.mxu1 %v1906_v4  ;;  %v2114_v43 = vor.u32 %v1474_v0, %v1315_v38  ;;  %v501_v4 = vshrl.u32 %v500_v42, 7 }
  0xca   : > { %938 = vmatpush.bf16.msrb.mxu2 %v2114_v43  ;;  %v506_v58 = vadd.s32 4294967295, %v501_v4 }
  0xcb   : > { %975 = vmatpush.bf16.msra.mxu0 %v1789_v17  ;;  %v2128_v17 = vor.u32 %v1490_v46, %v1379_v54 }
  0xcc   : > { %993 = vmatpush.bf16.msra.mxu1 %v1950_v22  ;;  %vm509_vm3 = vcmp.ge.s32.totalorder %v506_v58, 0  ;;  %v503_v22 = vadd.s32 16, %v501_v4 }
  0xcd   : > { %952 = vmatpush.bf16.msrb.mxu3 %v2128_v17 }
  0xce   : > { %v508_v15 = vadd.s32 4294967295, %v503_v22 }
  0xcf   : > { %976 = vmatpush.bf16.msra.mxu0 %v1829_v33 }
  0xd0   : > { %vm514_vm4 = vcmp.lt.s32.totalorder %v508_v15, 16 }
  0xd3   : > { %977 = vmatpush.bf16.msra.mxu0 %v1865_v49 }
  0xd7   : > { %978 = vmatpush.bf16.msra.mxu0 %v1890_v59 }
  0xdb   : > { %979 = vmatpush.bf16.msra.mxu0 %v1917_v8 }
 0x114   : > { %v384_v52 = vpop.f32.mrf.mxu0 }
 0x115   : > { %v385_v55 = vadd.f32 %v1550_v44, %v384_v52 }
 0x117   : > { %v494_v61 = vmax.f32 %v385_v55, 0.0 }
 0x119   : > { %v524_v3 = vsel %vm509_vm3, %v494_v61, 0.0 }
 0x11a   : > { %v527_v11 = vpack.c.bf16 %v524_v3, %v524_v3 }
 0x11c   : > { %v386_v63 = vpop.f32.mrf.mxu0  ;;  %v594_v49 = vunpack.c.l.b16 %v527_v11 }
 0x11d   : > { %v387_v5 = vadd.f32 %v1550_v44, %v386_v63 }
 0x11f   : > { %v495_v6 = vmax.f32 %v387_v5, 0.0  ;;  %v485_v10 = vpop.f32.mrf.mxu1 }
 0x120   : > { %v486_v19 = vadd.f32 %v1550_v44, %v485_v10 }
 0x121   : > { %v528_v33 = vpack.c.bf16 %v495_v6, %v495_v6 }
 0x122   : > { %v497_v20 = vmax.f32 %v486_v19, 0.0 }
 0x123   : > { %v595_v37 = vunpack.c.l.b16 %v528_v33 }
 0x124   : > { %v389_v35 = vpop.f32.mrf.mxu0  ;;  %v530_v59 = vsel %vm509_vm3, %v497_v20, 0.0 }
 0x125   : > { %v390_v24 = vadd.f32 %v1550_v44, %v389_v35  ;;  %v597_v48 = vpack.c.b16 %v595_v37, %v594_v49  ;;  %v533_v38 = vpack.c.bf16 %v530_v59, %v530_v59 }
 0x127   : > { %v496_v28 = vmax.f32 %v390_v24, 0.0  ;;  %v487_v42 = vpop.f32.mrf.mxu1  ;;  %v602_v0 = vshll.u32 %v597_v48, 16  ;;  %v587_v61 = vunpack.c.l.b16 %v533_v38  ;;  %v600_v22 = vshrl.u32 %v597_v48, 16 }
 0x128   : > { %v488_v51 = vadd.f32 %v1550_v44, %v487_v42 }
 0x129   : > { %v526_v31 = vsel %vm514_vm4, %v496_v28, 0.0  ;;  %v604_v55 = vrot.slane %v602_v0, 1 }
 0x12a   : > { %v529_v4 = vpack.c.bf16 %v526_v31, %v526_v31  ;;  %v498_v8 = vmax.f32 %v488_v51, 0.0 }
 0x12b   : > { %v605_v11 = vor.u32 %v604_v55, %v600_v22 }
 0x12c   : > { %v596_v46 = vunpack.c.l.b16 %v529_v4  ;;  %v534_v54 = vpack.c.bf16 %v498_v8, %v498_v8  ;;  %v391_v52 = vpop.f32.mrf.mxu0 }
 0x12e   : > { %v598_v63 = vpack.c.b16 %v596_v46, %v596_v46  ;;  %v588_v3 = vunpack.c.l.b16 %v534_v54 }
 0x12f   : > { %v490_v5 = vpop.f32.mrf.mxu1 }
 0x130   : > { %v607_v58 = vshll.u32 %v598_v63, 16  ;;  %v589_v6 = vpack.c.b16 %v588_v3, %v587_v61  ;;  %v491_v10 = vadd.f32 %v1550_v44, %v490_v5 }
 0x132   : > { %v609_v19 = vrot.slane %v607_v58, 1  ;;  %v499_v33 = vmax.f32 %v491_v10, 0.0  ;;  %883 = vmatmul.bf16.vlgmr.msra.gmra.mxu2 %v589_v6  ;;  %925 = vmatmul.bf16.vlgmr.msrb.gmra.mxu1 %v589_v6  ;;  %v618_v35 = vshll.u32 %v589_v6, 16 }
 0x133   : > { %1000 = vmatpush.bf16.msra.mxu2 %v1770_v9  ;;  %1042 = vmatpush.bf16.msrb.mxu1 %v1960_v27  ;;  %v616_v27 = vshrl.u32 %v589_v6, 16 }
 0x134   : > { %v532_v37 = vsel %vm514_vm4, %v499_v33, 0.0  ;;  %v610_v20 = vsel %vm410_vm2, %v605_v11, %v609_v19  ;;  %v620_v59 = vrot.slane %v618_v35, 1 }
 0x135   : > { %v535_v49 = vpack.c.bf16 %v532_v37, %v532_v37  ;;  %897 = vmatmul.bf16.vlgmr.msra.gmra.mxu3 %v610_v20 }
 0x136   : > { %1014 = vmatpush.bf16.msra.mxu3 %v1696_v41  ;;  %v621_v28 = vor.u32 %v620_v59, %v616_v27 }
 0x137   : > { %v613_v24 = vunpack.c.l.b16 %v535_v49  ;;  %v492_v44 = vpop.f32.mrf.mxu1  ;;  %1001 = vmatpush.bf16.msra.mxu2 %v1808_v23  ;;  %1043 = vmatpush.bf16.msrb.mxu1 %v1989_v39 }
 0x139   : > { %v614_v48 = vpack.c.b16 %v613_v24, %v613_v24 }
 0x13a   : > { %1015 = vmatpush.bf16.msra.mxu3 %v1725_v53  ;;  %v962_v53 = vshll.u32 %v610_v20, 16 }
 0x13b   : > { %v623_v9 = vshll.u32 %v614_v48, 16  ;;  %1002 = vmatpush.bf16.msra.mxu2 %v1832_v34  ;;  %1044 = vmatpush.bf16.msrb.mxu1 %v2017_v57 }
 0x13c   : > { %v964_v23 = vrot.slane %v962_v53, 1 }
 0x13d   : > { %v625_v15 = vrot.slane %v623_v9, 1 }
 0x13e   : > { %1016 = vmatpush.bf16.msra.mxu3 %v1755_v2  ;;  %v628_v2 = vshrl.u32 %v598_v63, 16 }
 0x13f   : > { %1003 = vmatpush.bf16.msra.mxu2 %v1868_v50  ;;  %1045 = vmatpush.bf16.msrb.mxu1 %v2045_v7  ;;  %v626_v41 = vsel %vm410_vm2, %v621_v28, %v625_v15 }
 0x140   : > { %911 = vmatmul.bf16.vlgmr.msrb.gmra.mxu0 %v626_v41  ;;  %v967_v34 = vshll.u32 %v628_v2, 16 }
 0x141   : > { %1028 = vmatpush.bf16.msrb.mxu0 %v1931_v14 }
 0x142   : > { %939 = vmatmul.bf16.vlgmr.msrb.gmra.mxu2 %v610_v20  ;;  %994 = vmatmul.bf16.vlgmr.msra.gmra.mxu1 %v626_v41  ;;  %v969_v14 = vrot.slane %v967_v34, 1 }
 0x143   : > { %1017 = vmatpush.bf16.msra.mxu3 %v1810_v26  ;;  %1004 = vmatpush.bf16.msra.mxu2 %v1940_v18  ;;  %v960_v26 = vshrl.u32 %v610_v20, 16 }
 0x144   : > { %1046 = vmatpush.bf16.msrb.mxu1 %v2065_v16 }
 0x145   : > { %953 = vmatmul.bf16.vlgmr.msrb.gmra.mxu3 %v626_v41  ;;  %1029 = vmatpush.bf16.msrb.mxu0 %v1969_v30  ;;  %v965_v50 = vor.u32 %v964_v23, %v960_v26 }
 0x147   : > { %1018 = vmatpush.bf16.msra.mxu3 %v1847_v40  ;;  %1005 = vmatpush.bf16.msra.mxu2 %v1978_v32  ;;  %v970_v40 = vsel %vm410_vm2, %v965_v50, %v969_v14 }
 0x148   : > { %1047 = vmatpush.bf16.msrb.mxu1 %v2085_v25 }
 0x149   : > { %1030 = vmatpush.bf16.msrb.mxu0 %v1997_v45 }
 0x14b   : > { %1019 = vmatpush.bf16.msra.mxu3 %v1881_v56  ;;  %1006 = vmatpush.bf16.msra.mxu2 %v2006_v47  ;;  %v584_v56 = vld [vmem:[%s2204_s4] sm:$0x3] }
 0x14c   : > { %1048 = vmatpush.bf16.msrb.mxu1 %v2105_v36  ;;  %v631_v18 = vperm.slane %v584_v56, 0 }
 0x14d   : > { %1031 = vmatpush.bf16.msrb.mxu0 %v2025_v62 }
 0x14f   : > { %1020 = vmatpush.bf16.msra.mxu3 %v1895_v60  ;;  %1007 = vmatpush.bf16.msra.mxu2 %v2034_v1  ;;  %v632_v1 = vperm.slane %v584_v56, 1 }
 0x150   : > { %1049 = vmatpush.bf16.msrb.mxu1 %v2128_v17  ;;  %980 = vmatmul.bf16.vlgmr.msra.gmra.mxu0 %v610_v20 }
 0x151   : > { %1032 = vmatpush.bf16.msrb.mxu0 %v2054_v12 }
 0x152   : > { %1008 = vmatmul.bf16.vlgmr.msra.gmra.mxu2 %v970_v40 }
 0x153   : > { %1021 = vmatpush.bf16.msra.mxu3 %v1929_v13  ;;  %1050 = vmatmul.bf16.vlgmr.msrb.gmra.mxu1 %v970_v40 }
 0x155   : > { %1033 = vmatpush.bf16.msrb.mxu0 %v2074_v21 }
 0x156   : > { %1022 = vmatmul.bf16.vlgmr.msra.gmra.mxu3 %v610_v20 }
 0x159   : > { %1034 = vmatpush.bf16.msrb.mxu0 %v2094_v29 }
 0x15d   : > { %1035 = vmatpush.bf16.msrb.mxu0 %v2114_v43 }
 0x160   : > { %1036 = vmatmul.bf16.vlgmr.msrb.gmra.mxu0 %v626_v41 }
 0x1af   : > { %v926_v60 = vpop.f32.mrf.mxu1 }
 0x1b0   : > { %v927_v21 = vadd.f32 %v926_v60, %v632_v1 }
 0x1b5   : > { %v884_v30 = vpop.f32.mrf.mxu2 }
 0x1b6   : > { %v885_v32 = vadd.f32 %v884_v30, %v631_v18 }
 0x1b7   : > { %v928_v57 = vpop.f32.mrf.mxu1 }
 0x1b8   : > { %v898_v39 = vpop.f32.mrf.mxu3  ;;  %v929_v4 = vadd.f32 %v928_v57, %v632_v1 }
 0x1b9   : > { %v899_v13 = vadd.f32 %v898_v39, %v885_v32 }
 0x1bd   : > { %v886_v45 = vpop.f32.mrf.mxu2  ;;  %v912_v47 = vpop.f32.mrf.mxu0 }
 0x1be   : > { %v913_v62 = vadd.f32 %v912_v47, %v899_v13  ;;  %v887_v7 = vadd.f32 %v886_v45, %v631_v18 }
 0x1bf   : > { %v995_v42 = vpop.f32.mrf.mxu1 }
 0x1c0   : > { %v1056_v12 = vmax.f32 %v913_v62, 0.0  ;;  %v900_v16 = vpop.f32.mrf.mxu3 }
 0x1c1   : > { %v901_v25 = vadd.f32 %v900_v16, %v887_v7 }
 0x1c2   : > { %1060 = vst [vmem:[%s2181_s24] sm:$0xff] %v1056_v12 }
 0x1c5   : > { %v914_v29 = vpop.f32.mrf.mxu0  ;;  %v940_v36 = vpop.f32.mrf.mxu2 }
 0x1c6   : > { %v915_v43 = vadd.f32 %v914_v29, %v901_v25  ;;  %v941_v17 = vadd.f32 %v940_v36, %v927_v21 }
 0x1c7   : > { %v997_v63 = vpop.f32.mrf.mxu1 }
 0x1c8   : > { %v1058_v51 = vmax.f32 %v915_v43, 0.0  ;;  %v954_v31 = vpop.f32.mrf.mxu3 }
 0x1c9   : > { %v955_v0 = vadd.f32 %v954_v31, %v941_v17 }
 0x1ca   : > { %1062 = vst [vmem:[%s2181_s24 + $0x20] sm:$0xff] %v1058_v51 }
 0x1cb   : > { %v1057_v38 = vmax.f32 %v955_v0, 0.0 }
 0x1cd   : > { %1061 = vst [vmem:[%s2181_s24 + $0x8] sm:$0xff] %v1057_v38  ;;  %v942_v8 = vpop.f32.mrf.mxu2  ;;  %v981_v46 = vpop.f32.mrf.mxu0 }
 0x1ce   : > { %v943_v54 = vadd.f32 %v942_v8, %v929_v4  ;;  %v982_v52 = vadd.f32 %v981_v46, %v631_v18 }
 0x1d0   : > { %v956_v55 = vpop.f32.mrf.mxu3  ;;  %v996_v5 = vadd.f32 %v995_v42, %v982_v52  ;;  %v1051_v33 = vpop.f32.mrf.mxu1 }
 0x1d1   : > { %v957_v61 = vadd.f32 %v956_v55, %v943_v54 }
 0x1d3   : > { %v1059_v3 = vmax.f32 %v957_v61, 0.0 }
 0x1d5   : > { %1063 = vst [vmem:[%s2181_s24 + $0x28] sm:$0xff] %v1059_v3  ;;  %v983_v22 = vpop.f32.mrf.mxu0  ;;  %v1009_v58 = vpop.f32.mrf.mxu2 }
 0x1d6   : > { %v1010_v6 = vadd.f32 %v1009_v58, %v996_v5  ;;  %v984_v10 = vadd.f32 %v983_v22, %v631_v18 }
 0x1d8   : > { %v1064_v11 = vmax.f32 %v1010_v6, 0.0  ;;  %v998_v20 = vadd.f32 %v997_v63, %v984_v10  ;;  %v1053_v53 = vpop.f32.mrf.mxu1 }
 0x1d9   : > { %v1023_v19 = vpop.f32.mrf.mxu3 }
 0x1da   : > { %1068 = vst [vmem:[%s2181_s24 + $0x10] sm:$0xff] %v1064_v11  ;;  %v1024_v37 = vadd.f32 %v1023_v19, %v632_v1 }
 0x1dd   : > { %v1011_v49 = vpop.f32.mrf.mxu2  ;;  %v1037_v35 = vpop.f32.mrf.mxu0 }
 0x1de   : > { %v1012_v24 = vadd.f32 %v1011_v49, %v998_v20  ;;  %v1038_v44 = vadd.f32 %v1037_v35, %v1024_v37 }
 0x1e0   : > { %v1066_v48 = vmax.f32 %v1012_v24, 0.0  ;;  %v1052_v59 = vadd.f32 %v1051_v33, %v1038_v44 }
 0x1e1   : > { %v1025_v9 = vpop.f32.mrf.mxu3 }
 0x1e2   : > { %1070 = vst [vmem:[%s2181_s24 + $0x30] sm:$0xff] %v1066_v48  ;;  %v1065_v27 = vmax.f32 %v1052_v59, 0.0  ;;  %v1026_v15 = vadd.f32 %v1025_v9, %v632_v1 }
 0x1e4   : > { %1069 = vst [vmem:[%s2181_s24 + $0x18] sm:$0xff] %v1065_v27 }
 0x1e5   : > { %v1039_v28 = vpop.f32.mrf.mxu0 }
 0x1e6   : > { %v1040_v41 = vadd.f32 %v1039_v28, %v1026_v15 }
 0x1e8   : > { %v1054_v2 = vadd.f32 %v1053_v53, %v1040_v41 }
 0x1ea   : > { %v1067_v23 = vmax.f32 %v1054_v2, 0.0 }
 0x1ec   : > { %1071 = vst [vmem:[%s2181_s24 + $0x38] sm:$0xff] %v1067_v23 }
 0x1ed PF: > { %s16_s20 = sadd.s32 1, %s1607_s20   ;;  %s2206_s18 = smov %s1603_s19 }
 0x1ee   : > { %p13_p8 = scmp.ge.s32.totalorder %s16_s20, 4   ;;  %s2207_s19 = smov %s2209_s22 }
 0x1f0   :  { %15 = sbr.rel (!%p13_p8) target bundleno = 2 (0x2), region = 77 }
 0x1f5   :  { %1104 = vsyncpa [#allocation3], 1 }
 0x1f6   :  { %1106 = vsyncpa [#allocation3 + $0x1], 1 }

</bundles_post_ra>
